<compile_context>
chip_gen: v6e
topology: v6e:2x2x1
jax: 0.10.0
libtpu: 0.0.40
codegen_flags: <defaults>
</compile_context>

<pallas_src>
import math

import jax
import jax.numpy as jnp
from jax.experimental import pallas as pl
from jax.experimental.pallas import tpu as pltpu

HIDDEN_SIZE = 32       # small stand-in for the module's 256
NUM_LAYERS = 2
NUM_DIRECTIONS = 2
VOCAB_SIZE = 16        # "input_size" of the embedding


# ----------------------------- Pallas kernel ------------------------------- #
def encoder_step_kernel(tok_ref, emb_ref, w_ref, b_ref, h0_ref, c0_ref,
                        out_ref, hn_ref, cn_ref):
    """Whole EncoderRNN forward step, all 4 (layer, direction) cells fused.

    tok_ref : (1,)          token index in SMEM (scalar prefetch; only used by
                            the embedding index_map)
    emb_ref : (1, 1, H)     gathered embedding row
    w_ref   : (L, 4H, 8H)   fused per-layer weights, gate-grouped columns
    b_ref   : (L, 1, 8H)    fused per-layer biases (b_ih + b_hh), same layout
    h0_ref  : (L, 1, 2H)    previous hidden state, packed [fwd || bwd]
    c0_ref  : (L, 1, 2H)    previous cell state,   packed [fwd || bwd]
    out_ref : (1, 1, 2H)    LSTM output (fwd || bwd of last layer)
    hn_ref  : (L, 1, 2H)    new hidden state (packed)
    cn_ref  : (L, 1, 2H)    new cell state   (packed)
    """
    del tok_ref  # only consumed by the embedding index_map
    H = HIDDEN_SIZE

    x = emb_ref[0]                                             # (1, H)
    # Layer-0 input padded to (1, 2H); the matching weight rows are zero.
    layer_in = jnp.concatenate(
        [x, jnp.zeros((1, H), jnp.float32)], axis=-1)          # (1, 2H)

    for layer in range(NUM_LAYERS):                            # unrolled (static)
        h_prev = h0_ref[layer]                                 # (1, 2H) fwd||bwd
        c_prev = c0_ref[layer]                                 # (1, 2H) fwd||bwd

        # One MXU op computes all gates of BOTH directions of this layer.
        xh = jnp.concatenate([layer_in, h_prev], axis=-1)      # (1, 4H)
        gates = jnp.dot(xh, w_ref[layer],
                        preferred_element_type=jnp.float32) + b_ref[layer]  # (1, 8H)

        # Two full-width EUP passes; gate-grouped columns -> contiguous slices.
        sg = jax.nn.sigmoid(gates)
        th = jnp.tanh(gates)
        i = sg[:, 0 * H:2 * H]                                 # [i_f | i_b]
        f = sg[:, 2 * H:4 * H]                                 # [f_f | f_b]
        g = th[:, 4 * H:6 * H]                                 # [g_f | g_b]
        o = sg[:, 6 * H:8 * H]                                 # [o_f | o_b]

        c_new = f * c_prev + i * g                             # (1, 2H)
        h_new = o * jnp.tanh(c_new)                            # (1, 2H) fwd||bwd

        hn_ref[layer] = h_new
        cn_ref[layer] = c_new

        # Packed [fwd || bwd] IS the next layer's input: no concat needed.
        layer_in = h_new

    out_ref[0] = layer_in                                      # (1, 2H)


# ------------------------------ wrapper ------------------------------------- #
@jax.jit
def encoder_forward(params, token, hidden):
    """EncoderRNN.forward(input, hidden) for a single token index."""
    h0, c0 = hidden                      # each (2*num_layers, 1, H), PyTorch layout
    H = HIDDEN_SIZE
    L = NUM_LAYERS
    emb3 = params["embedding"].reshape(VOCAB_SIZE, 1, H)   # row-gatherable view
    w = params["w_fused"]                # (L, 4H, 8H)
    b = params["b_fused"]                # (L, 1, 8H)
    tok = token.reshape(1).astype(jnp.int32)

    # PyTorch (2L, 1, H) layout (idx = layer*2 + dir) has the exact flat
    # element order of (L, 1, 2H) packed fwd||bwd -> reshapes are free.
    h0p = h0.reshape(L, 1, 2 * H)
    c0p = c0.reshape(L, 1, 2 * H)

    # Advisory cost hint so XLA does not schedule the tiny call pessimistically.
    flops = 2 * L * (4 * H) * (8 * H)
    transcendentals = L * (8 * H + 8 * H + 2 * H)
    bytes_accessed = 4 * (w.size + b.size + 3 * h0.size + 3 * c0.size + 3 * H)

    grid_spec = pltpu.PrefetchScalarGridSpec(
        num_scalar_prefetch=1,           # token index -> SMEM, drives index_map
        grid=(1,),
        in_specs=[
            # gather exactly one embedding row, chosen by the prefetched token
            pl.BlockSpec((1, 1, H), lambda i, tok: (tok[0], 0, 0)),
            pl.BlockSpec(w.shape,   lambda i, tok: (0, 0, 0)),
            pl.BlockSpec(b.shape,   lambda i, tok: (0, 0, 0)),
            pl.BlockSpec(h0p.shape, lambda i, tok: (0, 0, 0)),
            pl.BlockSpec(c0p.shape, lambda i, tok: (0, 0, 0)),
        ],
        out_specs=(
            pl.BlockSpec((1, 1, 2 * H), lambda i, tok: (0, 0, 0)),
            pl.BlockSpec(h0p.shape,     lambda i, tok: (0, 0, 0)),
            pl.BlockSpec(c0p.shape,     lambda i, tok: (0, 0, 0)),
        ),
    )

    output, h_np, c_np = pl.pallas_call(
        encoder_step_kernel,
        out_shape=(
            jax.ShapeDtypeStruct((1, 1, 2 * H), jnp.float32),
            jax.ShapeDtypeStruct(h0p.shape, jnp.float32),
            jax.ShapeDtypeStruct(c0p.shape, jnp.float32),
        ),
        grid_spec=grid_spec,
        compiler_params=pltpu.CompilerParams(
            dimension_semantics=("arbitrary",)),
        cost_estimate=pl.CostEstimate(
            flops=flops, transcendentals=transcendentals,
            bytes_accessed=bytes_accessed),
    )(tok, emb3, w, b, h0p, c0p)

    # back to PyTorch (2*num_layers, 1, H) layout (free reshape)
    h_n = h_np.reshape(NUM_DIRECTIONS * L, 1, H)
    c_n = c_np.reshape(NUM_DIRECTIONS * L, 1, H)
    # TODO(synk): if this encoder is driven over a whole token sequence, move
    # the time loop into the kernel (grid over timesteps, h/c in VMEM scratch)
    # to amortize launch/DMA cost; the module's forward() itself is single-step.
    return output, (h_n, c_n)


# ------------------------------ parameters --------------------------------- #
def init_params(key, vocab, hidden, num_layers):
    """Deterministic init matching the PyTorch parameter shapes, plus the fused
    gate-grouped per-layer weight/bias stacks consumed by the kernel.

    Fused weight W_l (4H, 8H), rows:
        [0:2H)  -> layer input (layer-0 rows H..2H are zero-padded)
        [2H:3H) -> h_fwd   (forward-direction gate columns only)
        [3H:4H) -> h_bwd   (backward-direction gate columns only)
    columns: 8 blocks of width H, grouped by gate then direction:
        [i_f, i_b, f_f, f_b, g_f, g_b, o_f, o_b]
    """
    H = hidden
    params = {}
    k_emb, key = jax.random.split(key)
    # nn.Embedding default: N(0, 1)
    params["embedding"] = jax.random.normal(k_emb, (vocab, H), jnp.float32)

    bound = 1.0 / math.sqrt(H)   # nn.LSTM default: U(-1/sqrt(H), 1/sqrt(H))
    raw, w_fused, b_fused = [], [], []
    for layer in range(num_layers):
        d_in = H if layer == 0 else NUM_DIRECTIONS * H
        layer_raw = []
        for _direction in range(NUM_DIRECTIONS):
            key, k1, k2, k3, k4 = jax.random.split(key, 5)
            w_ih = jax.random.uniform(k1, (4 * H, d_in), jnp.float32, -bound, bound)
            w_hh = jax.random.uniform(k2, (4 * H, H), jnp.float32, -bound, bound)
            b_ih = jax.random.uniform(k3, (4 * H,), jnp.float32, -bound, bound)
            b_hh = jax.random.uniform(k4, (4 * H,), jnp.float32, -bound, bound)
            layer_raw.append((w_ih, w_hh, b_ih, b_hh))
        raw.append(layer_raw)

        (wif, whf, bif, bhf), (wib, whb, bib, bhb) = layer_raw
        wifT, whfT, wibT, whbT = wif.T, whf.T, wib.T, whb.T   # (d_in|H, 4H)
        bf = bif + bhf
        bb = bib + bhb

        W_l = jnp.zeros((4 * H, 8 * H), jnp.float32)
        b_cols = []
        for gi in range(4):                       # PyTorch gate order i, f, g, o
            src = slice(gi * H, (gi + 1) * H)     # columns in the raw (•,4H) mats
            col_f = slice((2 * gi) * H, (2 * gi + 1) * H)
            col_b = slice((2 * gi + 1) * H, (2 * gi + 2) * H)
            W_l = W_l.at[0:d_in, col_f].set(wifT[:, src])        # x  -> fwd gate
            W_l = W_l.at[0:d_in, col_b].set(wibT[:, src])        # x  -> bwd gate
            W_l = W_l.at[2 * H:3 * H, col_f].set(whfT[:, src])   # h_f -> fwd gate
            W_l = W_l.at[3 * H:4 * H, col_b].set(whbT[:, src])   # h_b -> bwd gate
            b_cols.append(bf[src])
            b_cols.append(bb[src])
        b_l = jnp.concatenate(b_cols).reshape(1, 8 * H)

        w_fused.append(W_l)
        b_fused.append(b_l)

    params["w_fused"] = jnp.stack(w_fused)   # (L, 4H, 8H)
    params["b_fused"] = jnp.stack(b_fused)   # (L, 1, 8H)
    params["raw"] = raw                      # PyTorch-format weights (reference)
    return params


# --------------------------- pure-JAX reference ----------------------------- #
def _ref_cell(x, h, c, w_ih, w_hh, b_ih, b_hh):
    H = h.shape[-1]
    gates = x @ w_ih.T + h @ w_hh.T + (b_ih + b_hh)[None, :]
    i = jax.nn.sigmoid(gates[:, 0 * H:1 * H])
    f = jax.nn.sigmoid(gates[:, 1 * H:2 * H])
    g = jnp.tanh(gates[:, 2 * H:3 * H])
    o = jax.nn.sigmoid(gates[:, 3 * H:4 * H])
    c_new = f * c + i * g
    return o * jnp.tanh(c_new), c_new


def encoder_forward_ref(params, token, hidden):
    h0, c0 = hidden
    layer_in = params["embedding"][token].reshape(1, HIDDEN_SIZE)
    h_n, c_n = [], []
    for layer in range(NUM_LAYERS):
        dir_outs = []
        for direction in range(NUM_DIRECTIONS):
            idx = layer * NUM_DIRECTIONS + direction
            w_ih, w_hh, b_ih, b_hh = params["raw"][layer][direction]
            h_new, c_new = _ref_cell(layer_in, h0[idx], c0[idx],
                                     w_ih, w_hh, b_ih, b_hh)
            dir_outs.append(h_new)
            h_n.append(h_new)
            c_n.append(c_new)
        layer_in = jnp.concatenate(dir_outs, axis=-1)
    return (layer_in.reshape(1, 1, NUM_DIRECTIONS * HIDDEN_SIZE),
            (jnp.stack(h_n, 0), jnp.stack(c_n, 0)))


# ---------------------------------- main ------------------------------------ #
if __name__ == "__main__":
    key = jax.random.PRNGKey(0)
    params = init_params(key, VOCAB_SIZE, HIDDEN_SIZE, NUM_LAYERS)

    # EncoderRNN.initHidden(): zeros (2*num_layers, 1, H) for both h and c
    h0 = jnp.zeros((NUM_DIRECTIONS * NUM_LAYERS, 1, HIDDEN_SIZE), jnp.float32)
    c0 = jnp.zeros((NUM_DIRECTIONS * NUM_LAYERS, 1, HIDDEN_SIZE), jnp.float32)
    token = jnp.array(3, dtype=jnp.int32)   # single token index, as in the module

    output, (h_n, c_n) = encoder_forward(params, token, (h0, c0))
    jax.block_until_ready((output, h_n, c_n))

    # sanity check against a pure-JAX reference built on the raw PyTorch weights
    out_r, (h_r, c_r) = encoder_forward_ref(params, token, (h0, c0))
    assert output.shape == (1, 1, NUM_DIRECTIONS * HIDDEN_SIZE)
    assert h_n.shape == (NUM_DIRECTIONS * NUM_LAYERS, 1, HIDDEN_SIZE)
    assert c_n.shape == (NUM_DIRECTIONS * NUM_LAYERS, 1, HIDDEN_SIZE)
    assert jnp.allclose(output, out_r, atol=1e-5)
    assert jnp.allclose(h_n, h_r, atol=1e-5)
    assert jnp.allclose(c_n, c_r, atol=1e-5)

    print("KERNEL_OK")
</pallas_src>

<mosaic_0001>
module attributes {stable_mosaic.version = 11 : i64} {
  func.func @encoder_step_kernel(%arg0: i32, %arg1: memref<1xi32, #tpu.memory_space<smem>>, %arg2: memref<1x1x32xf32, #tpu.memory_space<vmem>>, %arg3: memref<2x128x256xf32, #tpu.memory_space<vmem>>, %arg4: memref<2x1x256xf32, #tpu.memory_space<vmem>>, %arg5: memref<2x1x64xf32, #tpu.memory_space<vmem>>, %arg6: memref<2x1x64xf32, #tpu.memory_space<vmem>>, %arg7: memref<1x1x64xf32, #tpu.memory_space<vmem>>, %arg8: memref<2x1x64xf32, #tpu.memory_space<vmem>>, %arg9: memref<2x1x64xf32, #tpu.memory_space<vmem>>) attributes {dimension_semantics = [#tpu.dimension_semantics<arbitrary>], iteration_bounds = array<i64: 1>, scalar_prefetch = 1 : i64, scratch_operands = 0 : i64, tpu.core_type = #tpu.core_type<tc>, window_params = [{transform_indices = @transform_0, window_bounds = array<i64: 1, 1, 32>}, {pipeline_mode = #tpu.pipeline_mode<synchronous>, transform_indices = @transform_1, window_bounds = array<i64: 2, 128, 256>}, {pipeline_mode = #tpu.pipeline_mode<synchronous>, transform_indices = @transform_2, window_bounds = array<i64: 2, 1, 256>}, {pipeline_mode = #tpu.pipeline_mode<synchronous>, transform_indices = @transform_3, window_bounds = array<i64: 2, 1, 64>}, {pipeline_mode = #tpu.pipeline_mode<synchronous>, transform_indices = @transform_4, window_bounds = array<i64: 2, 1, 64>}, {pipeline_mode = #tpu.pipeline_mode<synchronous>, transform_indices = @transform_5, window_bounds = array<i64: 1, 1, 64>}, {pipeline_mode = #tpu.pipeline_mode<synchronous>, transform_indices = @transform_6, window_bounds = array<i64: 2, 1, 64>}, {pipeline_mode = #tpu.pipeline_mode<synchronous>, transform_indices = @transform_7, window_bounds = array<i64: 2, 1, 64>}]} {
    %c0 = arith.constant 0 : index
    %c0_0 = arith.constant 0 : index
    %c0_1 = arith.constant 0 : index
    %0 = vector.load %arg2[%c0, %c0_0, %c0_1] : memref<1x1x32xf32, #tpu.memory_space<vmem>>, vector<1x1x32xf32>
    %1 = vector.shape_cast %0 : vector<1x1x32xf32> to vector<1x32xf32>
    %cst = arith.constant 0.000000e+00 : f32
    %2 = vector.broadcast %cst : f32 to vector<1x32xf32>
    %3 = tpu.concatenate %1, %2 in 1 : vector<1x32xf32>, vector<1x32xf32> -> vector<1x64xf32>
    %c0_2 = arith.constant 0 : index
    %c0_3 = arith.constant 0 : index
    %c0_4 = arith.constant 0 : index
    %4 = vector.load %arg5[%c0_2, %c0_3, %c0_4] : memref<2x1x64xf32, #tpu.memory_space<vmem>>, vector<1x1x64xf32>
    %5 = vector.shape_cast %4 : vector<1x1x64xf32> to vector<1x64xf32>
    %c0_5 = arith.constant 0 : index
    %c0_6 = arith.constant 0 : index
    %c0_7 = arith.constant 0 : index
    %6 = vector.load %arg6[%c0_5, %c0_6, %c0_7] : memref<2x1x64xf32, #tpu.memory_space<vmem>>, vector<1x1x64xf32>
    %7 = vector.shape_cast %6 : vector<1x1x64xf32> to vector<1x64xf32>
    %8 = tpu.concatenate %3, %5 in 1 : vector<1x64xf32>, vector<1x64xf32> -> vector<1x128xf32>
    %c0_8 = arith.constant 0 : index
    %c0_9 = arith.constant 0 : index
    %c0_10 = arith.constant 0 : index
    %9 = vector.load %arg3[%c0_8, %c0_9, %c0_10] : memref<2x128x256xf32, #tpu.memory_space<vmem>>, vector<1x128x256xf32>
    %10 = vector.shape_cast %9 : vector<1x128x256xf32> to vector<128x256xf32>
    %cst_11 = arith.constant dense<0.000000e+00> : vector<1x256xf32>
    %11 = tpu.matmul %8, %10, %cst_11 {dimension_numbers = #tpu.dot_dimension_numbers<[1], [0], [0], [1], [0, 0, 1, 1], [], []>} : vector<1x128xf32>, vector<128x256xf32>, vector<1x256xf32> -> vector<1x256xf32>
    %c0_12 = arith.constant 0 : index
    %c0_13 = arith.constant 0 : index
    %c0_14 = arith.constant 0 : index
    %12 = vector.load %arg4[%c0_12, %c0_13, %c0_14] : memref<2x1x256xf32, #tpu.memory_space<vmem>>, vector<1x1x256xf32>
    %13 = vector.shape_cast %12 : vector<1x1x256xf32> to vector<1x256xf32>
    %14 = arith.addf %11, %13 : vector<1x256xf32>
    %15 = arith.negf %14 : vector<1x256xf32>
    %16 = math.exp %15 : vector<1x256xf32>
    %cst_15 = arith.constant 1.000000e+00 : f32
    %17 = vector.broadcast %cst_15 : f32 to vector<1x256xf32>
    %18 = arith.addf %17, %16 : vector<1x256xf32>
    %19 = arith.divf %17, %18 : vector<1x256xf32>
    %20 = math.tanh %14 : vector<1x256xf32>
    %21 = vector.extract_strided_slice %19 {offsets = [0, 0], sizes = [1, 64], strides = [1, 1]} : vector<1x256xf32> to vector<1x64xf32>
    %22 = vector.extract_strided_slice %19 {offsets = [0, 64], sizes = [1, 64], strides = [1, 1]} : vector<1x256xf32> to vector<1x64xf32>
    %23 = vector.extract_strided_slice %20 {offsets = [0, 128], sizes = [1, 64], strides = [1, 1]} : vector<1x256xf32> to vector<1x64xf32>
    %24 = vector.extract_strided_slice %19 {offsets = [0, 192], sizes = [1, 64], strides = [1, 1]} : vector<1x256xf32> to vector<1x64xf32>
    %25 = arith.mulf %22, %7 : vector<1x64xf32>
    %26 = arith.mulf %21, %23 : vector<1x64xf32>
    %27 = arith.addf %25, %26 : vector<1x64xf32>
    %28 = math.tanh %27 : vector<1x64xf32>
    %29 = arith.mulf %24, %28 : vector<1x64xf32>
    %c0_16 = arith.constant 0 : index
    %c0_17 = arith.constant 0 : index
    %c0_18 = arith.constant 0 : index
    %30 = vector.load %arg8[%c0_16, %c0_17, %c0_18] : memref<2x1x64xf32, #tpu.memory_space<vmem>>, vector<1x1x64xf32>
    %31 = vector.shape_cast %30 : vector<1x1x64xf32> to vector<1x64xf32>
    %32 = vector.shape_cast %29 : vector<1x64xf32> to vector<1x1x64xf32>
    tpu.vector_store %arg8[%c0_16, %c0_17, %c0_18], %32 {strides = array<i32>} : memref<2x1x64xf32, #tpu.memory_space<vmem>>, vector<1x1x64xf32>,
    %c0_19 = arith.constant 0 : index
    %c0_20 = arith.constant 0 : index
    %c0_21 = arith.constant 0 : index
    %33 = vector.load %arg9[%c0_19, %c0_20, %c0_21] : memref<2x1x64xf32, #tpu.memory_space<vmem>>, vector<1x1x64xf32>
    %34 = vector.shape_cast %33 : vector<1x1x64xf32> to vector<1x64xf32>
    %35 = vector.shape_cast %27 : vector<1x64xf32> to vector<1x1x64xf32>
    tpu.vector_store %arg9[%c0_19, %c0_20, %c0_21], %35 {strides = array<i32>} : memref<2x1x64xf32, #tpu.memory_space<vmem>>, vector<1x1x64xf32>,
    %c1 = arith.constant 1 : index
    %c0_22 = arith.constant 0 : index
    %c0_23 = arith.constant 0 : index
    %36 = vector.load %arg5[%c1, %c0_22, %c0_23] : memref<2x1x64xf32, #tpu.memory_space<vmem>>, vector<1x1x64xf32>
    %37 = vector.shape_cast %36 : vector<1x1x64xf32> to vector<1x64xf32>
    %c1_24 = arith.constant 1 : index
    %c0_25 = arith.constant 0 : index
    %c0_26 = arith.constant 0 : index
    %38 = vector.load %arg6[%c1_24, %c0_25, %c0_26] : memref<2x1x64xf32, #tpu.memory_space<vmem>>, vector<1x1x64xf32>
    %39 = vector.shape_cast %38 : vector<1x1x64xf32> to vector<1x64xf32>
    %40 = tpu.concatenate %29, %37 in 1 : vector<1x64xf32>, vector<1x64xf32> -> vector<1x128xf32>
    %c1_27 = arith.constant 1 : index
    %c0_28 = arith.constant 0 : index
    %c0_29 = arith.constant 0 : index
    %41 = vector.load %arg3[%c1_27, %c0_28, %c0_29] : memref<2x128x256xf32, #tpu.memory_space<vmem>>, vector<1x128x256xf32>
    %42 = vector.shape_cast %41 : vector<1x128x256xf32> to vector<128x256xf32>
    %cst_30 = arith.constant dense<0.000000e+00> : vector<1x256xf32>
    %43 = tpu.matmul %40, %42, %cst_30 {dimension_numbers = #tpu.dot_dimension_numbers<[1], [0], [0], [1], [0, 0, 1, 1], [], []>} : vector<1x128xf32>, vector<128x256xf32>, vector<1x256xf32> -> vector<1x256xf32>
    %c1_31 = arith.constant 1 : index
    %c0_32 = arith.constant 0 : index
    %c0_33 = arith.constant 0 : index
    %44 = vector.load %arg4[%c1_31, %c0_32, %c0_33] : memref<2x1x256xf32, #tpu.memory_space<vmem>>, vector<1x1x256xf32>
    %45 = vector.shape_cast %44 : vector<1x1x256xf32> to vector<1x256xf32>
    %46 = arith.addf %43, %45 : vector<1x256xf32>
    %47 = arith.negf %46 : vector<1x256xf32>
    %48 = math.exp %47 : vector<1x256xf32>
    %cst_34 = arith.constant 1.000000e+00 : f32
    %49 = vector.broadcast %cst_34 : f32 to vector<1x256xf32>
    %50 = arith.addf %49, %48 : vector<1x256xf32>
    %51 = arith.divf %49, %50 : vector<1x256xf32>
    %52 = math.tanh %46 : vector<1x256xf32>
    %53 = vector.extract_strided_slice %51 {offsets = [0, 0], sizes = [1, 64], strides = [1, 1]} : vector<1x256xf32> to vector<1x64xf32>
    %54 = vector.extract_strided_slice %51 {offsets = [0, 64], sizes = [1, 64], strides = [1, 1]} : vector<1x256xf32> to vector<1x64xf32>
    %55 = vector.extract_strided_slice %52 {offsets = [0, 128], sizes = [1, 64], strides = [1, 1]} : vector<1x256xf32> to vector<1x64xf32>
    %56 = vector.extract_strided_slice %51 {offsets = [0, 192], sizes = [1, 64], strides = [1, 1]} : vector<1x256xf32> to vector<1x64xf32>
    %57 = arith.mulf %54, %39 : vector<1x64xf32>
    %58 = arith.mulf %53, %55 : vector<1x64xf32>
    %59 = arith.addf %57, %58 : vector<1x64xf32>
    %60 = math.tanh %59 : vector<1x64xf32>
    %61 = arith.mulf %56, %60 : vector<1x64xf32>
    %c1_35 = arith.constant 1 : index
    %c0_36 = arith.constant 0 : index
    %c0_37 = arith.constant 0 : index
    %62 = vector.load %arg8[%c1_35, %c0_36, %c0_37] : memref<2x1x64xf32, #tpu.memory_space<vmem>>, vector<1x1x64xf32>
    %63 = vector.shape_cast %62 : vector<1x1x64xf32> to vector<1x64xf32>
    %64 = vector.shape_cast %61 : vector<1x64xf32> to vector<1x1x64xf32>
    tpu.vector_store %arg8[%c1_35, %c0_36, %c0_37], %64 {strides = array<i32>} : memref<2x1x64xf32, #tpu.memory_space<vmem>>, vector<1x1x64xf32>,
    %c1_38 = arith.constant 1 : index
    %c0_39 = arith.constant 0 : index
    %c0_40 = arith.constant 0 : index
    %65 = vector.load %arg9[%c1_38, %c0_39, %c0_40] : memref<2x1x64xf32, #tpu.memory_space<vmem>>, vector<1x1x64xf32>
    %66 = vector.shape_cast %65 : vector<1x1x64xf32> to vector<1x64xf32>
    %67 = vector.shape_cast %59 : vector<1x64xf32> to vector<1x1x64xf32>
    tpu.vector_store %arg9[%c1_38, %c0_39, %c0_40], %67 {strides = array<i32>} : memref<2x1x64xf32, #tpu.memory_space<vmem>>, vector<1x1x64xf32>,
    %c0_41 = arith.constant 0 : index
    %c0_42 = arith.constant 0 : index
    %c0_43 = arith.constant 0 : index
    %68 = vector.load %arg7[%c0_41, %c0_42, %c0_43] : memref<1x1x64xf32, #tpu.memory_space<vmem>>, vector<1x1x64xf32>
    %69 = vector.shape_cast %68 : vector<1x1x64xf32> to vector<1x64xf32>
    %70 = vector.shape_cast %61 : vector<1x64xf32> to vector<1x1x64xf32>
    tpu.vector_store %arg7[%c0_41, %c0_42, %c0_43], %70 {strides = array<i32>} : memref<1x1x64xf32, #tpu.memory_space<vmem>>, vector<1x1x64xf32>,
    return
  }
  func.func @transform_0(%arg0: i32, %arg1: memref<1xi32, #tpu.memory_space<smem>>) -> (i32, i32, i32) {
    %c0 = arith.constant 0 : index
    %0 = memref.load %arg1[%c0] : memref<1xi32, #tpu.memory_space<smem>>
    %c0_i32 = arith.constant 0 : i32
    %c0_i32_0 = arith.constant 0 : i32
    %c0_i32_1 = arith.constant 0 : i32
    return %0, %c0_i32, %c0_i32_0 : i32, i32, i32
  }
  func.func @transform_1(%arg0: i32, %arg1: memref<1xi32, #tpu.memory_space<smem>>) -> (i32, i32, i32) {
    %c0_i32 = arith.constant 0 : i32
    %c0_i32_0 = arith.constant 0 : i32
    %c0_i32_1 = arith.constant 0 : i32
    %c0_i32_2 = arith.constant 0 : i32
    return %c0_i32, %c0_i32_0, %c0_i32_1 : i32, i32, i32
  }
  func.func @transform_2(%arg0: i32, %arg1: memref<1xi32, #tpu.memory_space<smem>>) -> (i32, i32, i32) {
    %c0_i32 = arith.constant 0 : i32
    %c0_i32_0 = arith.constant 0 : i32
    %c0_i32_1 = arith.constant 0 : i32
    %c0_i32_2 = arith.constant 0 : i32
    return %c0_i32, %c0_i32_0, %c0_i32_1 : i32, i32, i32
  }
  func.func @transform_3(%arg0: i32, %arg1: memref<1xi32, #tpu.memory_space<smem>>) -> (i32, i32, i32) {
    %c0_i32 = arith.constant 0 : i32
    %c0_i32_0 = arith.constant 0 : i32
    %c0_i32_1 = arith.constant 0 : i32
    %c0_i32_2 = arith.constant 0 : i32
    return %c0_i32, %c0_i32_0, %c0_i32_1 : i32, i32, i32
  }
  func.func @transform_4(%arg0: i32, %arg1: memref<1xi32, #tpu.memory_space<smem>>) -> (i32, i32, i32) {
    %c0_i32 = arith.constant 0 : i32
    %c0_i32_0 = arith.constant 0 : i32
    %c0_i32_1 = arith.constant 0 : i32
    %c0_i32_2 = arith.constant 0 : i32
    return %c0_i32, %c0_i32_0, %c0_i32_1 : i32, i32, i32
  }
  func.func @transform_5(%arg0: i32, %arg1: memref<1xi32, #tpu.memory_space<smem>>) -> (i32, i32, i32) {
    %c0_i32 = arith.constant 0 : i32
    %c0_i32_0 = arith.constant 0 : i32
    %c0_i32_1 = arith.constant 0 : i32
    %c0_i32_2 = arith.constant 0 : i32
    return %c0_i32, %c0_i32_0, %c0_i32_1 : i32, i32, i32
  }
  func.func @transform_6(%arg0: i32, %arg1: memref<1xi32, #tpu.memory_space<smem>>) -> (i32, i32, i32) {
    %c0_i32 = arith.constant 0 : i32
    %c0_i32_0 = arith.constant 0 : i32
    %c0_i32_1 = arith.constant 0 : i32
    %c0_i32_2 = arith.constant 0 : i32
    return %c0_i32, %c0_i32_0, %c0_i32_1 : i32, i32, i32
  }
  func.func @transform_7(%arg0: i32, %arg1: memref<1xi32, #tpu.memory_space<smem>>) -> (i32, i32, i32) {
    %c0_i32 = arith.constant 0 : i32
    %c0_i32_0 = arith.constant 0 : i32
    %c0_i32_1 = arith.constant 0 : i32
    %c0_i32_2 = arith.constant 0 : i32
    return %c0_i32, %c0_i32_0, %c0_i32_1 : i32, i32, i32
  }
}

</mosaic_0001>

<bundles_post_ra>
// kernel: encoder_forward.1
= control target key start
LH: loop header
LB: loop body
LE: loop exit
PB: predicated region body
PF: predicated region fallthrough
CT: control target
= control target key end

     0   :  { %15 = vsyncpa [#allocation5], 0  ;;  %s644_s0 = inlined_call_operand.<no memory space> [shape: s32[1], index: 0, kind: input, shape index: {}]   ;;  %s645_s1 = inlined_call_operand.vmem [shape: f32[16,1,32], index: 1, kind: input, shape index: {}]   ;;  %s646_s2 = inlined_call_operand.hbm [shape: f32[2,128,256], index: 2, kind: input, shape index: {}]   ;;  %s647_s3 = inlined_call_operand.vmem [shape: f32[2,1,256], index: 3, kind: input, shape index: {}]   ;;  %s648_s4 = inlined_call_operand.vmem [shape: f32[2,1,64], index: 4, kind: input, shape index: {}]   ;;  %s649_s5 = inlined_call_operand.vmem [shape: f32[2,1,64], index: 5, kind: input, shape index: {}]   ;;  %s650_s6 = inlined_call_operand.hbm [shape: f32[1,1,64], index: 6, kind: output, shape index: {0}]   ;;  %s651_s7 = inlined_call_operand.vmem [shape: f32[2,1,64], index: 7, kind: output, shape index: {1}]   ;;  %s652_s8 = inlined_call_operand.vmem [shape: f32[2,1,64], index: 8, kind: output, shape index: {2}]  }
   0x1   :  { %16 = vsyncpa [#allocation6], 0  ;;  %s511_s27 = smov [#allocation4]  }
   0x2   :  { %s29_s28 = sshll.u32 %s511_s27, 4  ;;  %s30_s28 = int_to_ptr.vmem [resolvable:$true] %s29_s28 }
   0x3   :  { %s475_s29 = scalar_lea.vmem %s30_s28, 8192  ;;  %p480_p1 = scmp.lt.s32.totalorder %s30_s28, %s30_s28 }
   0x4   :  { %p476_p0 = scmp.ne.s32.totalorder %s30_s28, %s475_s29  ;;  %p481_p2 = scmp.lt.s32.totalorder %s475_s29, %s475_s29 }
   0x6   :  { %p482_p3 = por %p481_p2, %p480_p1 }
   0x8   :  { %p483_p4 = pnand %p482_p3, %p476_p0 }
   0xa   :  { %486 = shalt.err (!%p483_p4)
}
   0xb   :  { %s512_s30 = smov 256   ;;  %s513_s9 = smov 16  }
   0xc   :  { %35 = dma.hbm_to_vmem [thread:$0]  %s646_s2, 8192, %s30_s28, [#allocation5], %s512_s30, %s512_s30, %s513_s9  }
   0xd   :  { %507 = dma.done.wait [#allocation5], 8192  }
   0xe   :  { %508 = vsyncadd [#allocation5], 4294959104  ;;  %v514_v0 = vmov 0.0   ;;  %v424_v1 = vld [vmem:[%s648_s4] ss:$0 sm:$0xff]  ;;  %v100_v2 = vld [vmem:[#allocation4 + $0xf8] sm:$0xff]  ;;  %v103_v39 = vlaneseq }
   0xf   :  { %177 = vmatprep.mubr.f32.mxu0 %v514_v0  ;;  %348 = vmatprep.mubr.f32.mxu1 %v514_v0  ;;  %v99_v3 = vld [vmem:[#allocation4 + $0xf0] sm:$0xff]  ;;  %s515_s14 = smov 64   ;;  %v98_v4 = vld [vmem:[#allocation4 + $0xe8] sm:$0xff]  ;;  %v97_v5 = vld [vmem:[#allocation4 + $0xe0] sm:$0xff]  ;;  %p50_p5 = scmp.lt.s32.totalorder %s644_s0, 15  ;;  %vm55_vm0 = vcmask 261120  }
  0x10   :  { %64 = vrot.lane.b32.xlu0 %v424_v1, %s515_s14  ;;  %113 = vmatprep.subr.mxu0 %v100_v2  ;;  %v96_v6 = vld [vmem:[#allocation4 + $0xd8] sm:$0xff]  ;;  %v95_v7 = vld [vmem:[#allocation4 + $0xd0] sm:$0xff]  ;;  %v94_v8 = vld [vmem:[#allocation4 + $0xc8] sm:$0xff]  ;;  %vm67_vm1 = vcmask 523264   ;;  %v583_v40 = vshrl.u32 %v103_v39, 7  ;;  %vm218_vm2 = vcmask 516096  }
  0x11   :  { %114 = vmatpush1.msra.mxu0 %v99_v3  ;;  %v93_v9 = vld [vmem:[#allocation4 + $0xc0] sm:$0xff]  ;;  %v92_v10 = vld [vmem:[#allocation4 + $0xb8] sm:$0xff]  ;;  %v91_v11 = vld [vmem:[#allocation4 + $0xb0] sm:$0xff]  ;;  %s654_s0 = smov (!%p50_p5, %s644_s0), 15  ;;  %s516_s30 = smov [#allocation7]  }
  0x12   :  { %115 = vmatprep.subr.mxu0 %v98_v4  ;;  %v90_v12 = vld [vmem:[#allocation4 + $0xa8] sm:$0xff]  ;;  %v89_v13 = vld [vmem:[#allocation4 + $0xa0] sm:$0xff]  ;;  %v88_v14 = vld [vmem:[#allocation4 + $0x98] sm:$0xff]  ;;  %s52_s22 = scalar_lea.vmem %s645_s1, %s654_s0  ;;  %v105_v41 = vsub.s32 0, %v583_v40  ;;  %v109_v47 = vsub.s32 1, %v583_v40  ;;  %s404_s9 = sshll.u32 %s516_s30, 4  ;;  %s405_s9 = int_to_ptr.vmem [resolvable:$true] %s404_s9 }
  0x13   :  { %116 = vmatpush1.msra.mxu0 %v97_v5  ;;  %v87_v15 = vld [vmem:[#allocation4 + $0x90] sm:$0xff]  ;;  %v427_v16 = vld [vmem:[%s649_s5] ss:$0 sm:$0xff]  ;;  %v86_v17 = vld [vmem:[#allocation4 + $0x88] sm:$0xff]  ;;  %s487_s12 = scalar_lea.vmem %s405_s9, 16  ;;  %s491_s13 = scalar_lea.vmem %s405_s9, 32 }
  0x14   :  { %117 = vmatprep.subr.mxu0 %v96_v6  ;;  %202 = vrot.lane.b32.xlu0 %v427_v16, %s515_s14  ;;  %v85_v18 = vld [vmem:[#allocation4 + $0x80] sm:$0xff]  ;;  %v84_v19 = vld [vmem:[#allocation4 + $0x78] sm:$0xff]  ;;  %v83_v20 = vld [vmem:[#allocation4 + $0x70] sm:$0xff]  ;;  %p488_p6 = scmp.ne.s32.totalorder %s405_s9, %s487_s12  ;;  %p492_p7 = scmp.lt.s32.totalorder %s405_s9, %s405_s9 }
  0x15   :  { %118 = vmatpush1.msra.mxu0 %v95_v7  ;;  %v82_v21 = vld [vmem:[#allocation4 + $0x68] sm:$0xff]  ;;  %v81_v22 = vld [vmem:[#allocation4 + $0x60] sm:$0xff]  ;;  %v80_v23 = vld [vmem:[#allocation4 + $0x58] sm:$0xff]  ;;  %p493_p8 = scmp.lt.s32.totalorder %s491_s13, %s487_s12 }
  0x16   :  { %119 = vmatprep.subr.mxu0 %v94_v8  ;;  %v79_v24 = vld [vmem:[#allocation4 + $0x50] sm:$0xff]  ;;  %v78_v25 = vld [vmem:[#allocation4 + $0x48] sm:$0xff]  ;;  %v77_v26 = vld [vmem:[#allocation4 + $0x40] sm:$0xff] }
  0x17   :  { %120 = vmatpush1.msra.mxu0 %v93_v9  ;;  %v76_v27 = vld [vmem:[#allocation4 + $0x38] sm:$0xff]  ;;  %v75_v28 = vld [vmem:[#allocation4 + $0x30] sm:$0xff]  ;;  %v74_v29 = vld [vmem:[#allocation4 + $0x28] sm:$0xff]  ;;  %p494_p9 = por %p493_p8, %p492_p7 }
  0x18   :  { %121 = vmatprep.subr.mxu0 %v92_v10  ;;  %v73_v30 = vld [vmem:[#allocation4 + $0x20] sm:$0xff]  ;;  %v72_v31 = vld [vmem:[#allocation4 + $0x18] sm:$0xff]  ;;  %v71_v32 = vld [vmem:[#allocation4 + $0x10] sm:$0xff] }
  0x19   :  { %122 = vmatpush1.msra.mxu0 %v91_v11  ;;  %v70_v33 = vld [vmem:[#allocation4 + $0x8] sm:$0xff]  ;;  %v69_v34 = vld [vmem:[#allocation4] sm:$0xff]  ;;  %v270_v57 = vld [vmem:[#allocation4 + $0x1f8] sm:$0xff]  ;;  %p495_p10 = pnand %p494_p9, %p488_p6 }
  0x1a   :  { %123 = vmatprep.subr.mxu0 %v90_v12  ;;  %v54_v35 = vld [vmem:[%s52_s22] sm:$0x1]  ;;  %v430_v53 = vld [vmem:[%s648_s4 + $0x1] ss:$0 sm:$0xff]  ;;  %v269_v58 = vld [vmem:[#allocation4 + $0x1f0] sm:$0xff]  ;;  %284 = vmatprep.subr.mxu1 %v270_v57 }
  0x1b   :  { %124 = vmatpush1.msra.mxu0 %v89_v13  ;;  %v56_v36 = vsel %vm55_vm0, %v54_v35, 0.0  ;;  %v101_v42 = vld [vmem:[%s647_s3] sm:$0x3]  ;;  %234 = vrot.lane.b32.xlu0 %v430_v53, %s515_s14  ;;  %v268_v59 = vld [vmem:[#allocation4 + $0x1e8] sm:$0xff]  ;;  %v266_v61 = vld [vmem:[#allocation4 + $0x1d8] sm:$0xff] }
  0x1c   :  { %125 = vmatprep.subr.mxu0 %v88_v14  ;;  %v106_v43 = vrot.slane %v101_v42, %v105_v41  ;;  %v110_v48 = vrot.slane %v101_v42, %v109_v47  ;;  %v267_v60 = vld [vmem:[#allocation4 + $0x1e0] sm:$0xff]  ;;  %285 = vmatpush1.msra.mxu1 %v269_v58  ;;  %v265_v62 = vld [vmem:[#allocation4 + $0x1d0] sm:$0xff]  ;;  %v264_v63 = vld [vmem:[#allocation4 + $0x1c8] sm:$0xff] }
  0x1d   :  { %126 = vmatpush1.msra.mxu0 %v87_v15  ;;  %286 = vmatprep.subr.mxu1 %v268_v59  ;;  %v263_v0 = vld [vmem:[#allocation4 + $0x1c0] sm:$0xff]  ;;  %v262_v1 = vld [vmem:[#allocation4 + $0x1b8] sm:$0xff]  ;;  %v261_v2 = vld [vmem:[#allocation4 + $0x1b0] sm:$0xff] }
  0x1e   :  { %127 = vmatprep.subr.mxu0 %v86_v17  ;;  %287 = vmatpush1.msra.mxu1 %v267_v60  ;;  %v260_v3 = vld [vmem:[#allocation4 + $0x1a8] sm:$0xff]  ;;  %v259_v4 = vld [vmem:[#allocation4 + $0x1a0] sm:$0xff]  ;;  %v258_v5 = vld [vmem:[#allocation4 + $0x198] sm:$0xff] }
  0x1f   :  { %128 = vmatpush1.msra.mxu0 %v85_v18  ;;  %288 = vmatprep.subr.mxu1 %v266_v61  ;;  %v257_v6 = vld [vmem:[#allocation4 + $0x190] sm:$0xff]  ;;  %v256_v7 = vld [vmem:[#allocation4 + $0x188] sm:$0xff]  ;;  %v255_v8 = vld [vmem:[#allocation4 + $0x180] sm:$0xff] }
  0x20   :  { %129 = vmatprep.subr.mxu0 %v84_v19  ;;  %289 = vmatpush1.msra.mxu1 %v265_v62  ;;  %v254_v9 = vld [vmem:[#allocation4 + $0x178] sm:$0xff]  ;;  %v253_v10 = vld [vmem:[#allocation4 + $0x170] sm:$0xff]  ;;  %v252_v11 = vld [vmem:[#allocation4 + $0x168] sm:$0xff] }
  0x21   :  { %130 = vmatpush1.msra.mxu0 %v83_v20  ;;  %290 = vmatprep.subr.mxu1 %v264_v63  ;;  %v251_v12 = vld [vmem:[#allocation4 + $0x160] sm:$0xff]  ;;  %v250_v13 = vld [vmem:[#allocation4 + $0x158] sm:$0xff]  ;;  %v249_v14 = vld [vmem:[#allocation4 + $0x150] sm:$0xff] }
  0x22   :  { %131 = vmatprep.subr.mxu0 %v82_v21  ;;  %291 = vmatpush1.msra.mxu1 %v263_v0  ;;  %v248_v15 = vld [vmem:[#allocation4 + $0x148] sm:$0xff]  ;;  %v247_v16 = vld [vmem:[#allocation4 + $0x140] sm:$0xff]  ;;  %v246_v17 = vld [vmem:[#allocation4 + $0x138] sm:$0xff] }
  0x23   :  { %132 = vmatpush1.msra.mxu0 %v81_v22  ;;  %292 = vmatprep.subr.mxu1 %v262_v1  ;;  %v245_v18 = vld [vmem:[#allocation4 + $0x130] sm:$0xff]  ;;  %v244_v19 = vld [vmem:[#allocation4 + $0x128] sm:$0xff]  ;;  %v243_v20 = vld [vmem:[#allocation4 + $0x120] sm:$0xff] }
  0x24   :  { %133 = vmatprep.subr.mxu0 %v80_v23  ;;  %293 = vmatpush1.msra.mxu1 %v261_v2  ;;  %v242_v21 = vld [vmem:[#allocation4 + $0x118] sm:$0xff]  ;;  %v241_v22 = vld [vmem:[#allocation4 + $0x110] sm:$0xff]  ;;  %v240_v23 = vld [vmem:[#allocation4 + $0x108] sm:$0xff] }
  0x25   :  { %134 = vmatpush1.msra.mxu0 %v79_v24  ;;  %294 = vmatprep.subr.mxu1 %v260_v3  ;;  %v434_v35 = vld [vmem:[%s649_s5 + $0x1] ss:$0 sm:$0xff]  ;;  %v431_v39 = vld [vmem:[%s647_s3 + $0x2] sm:$0x3] }
  0x26   :  { %135 = vmatprep.subr.mxu0 %v78_v25  ;;  %295 = vmatpush1.msra.mxu1 %v259_v4  ;;  %v277_v42 = vrot.slane %v431_v39, %v105_v41 }
  0x27   :  { %136 = vmatpush1.msra.mxu0 %v77_v26  ;;  %296 = vmatprep.subr.mxu1 %v258_v5 }
  0x28   :  { %137 = vmatprep.subr.mxu0 %v76_v27  ;;  %297 = vmatpush1.msra.mxu1 %v257_v6 }
  0x29   :  { %138 = vmatpush1.msra.mxu0 %v75_v28  ;;  %298 = vmatprep.subr.mxu1 %v256_v7 }
  0x2a   :  { %139 = vmatprep.subr.mxu0 %v74_v29  ;;  %299 = vmatpush1.msra.mxu1 %v255_v8 }
  0x2b   :  { %140 = vmatpush1.msra.mxu0 %v73_v30  ;;  %300 = vmatprep.subr.mxu1 %v254_v9 }
  0x2c   :  { %141 = vmatprep.subr.mxu0 %v72_v31  ;;  %301 = vmatpush1.msra.mxu1 %v253_v10  ;;  %v239_v31 = vld [vmem:[#allocation4 + $0x100] sm:$0xff] }
  0x2d   :  { %142 = vmatpush1.msra.mxu0 %v71_v32  ;;  %302 = vmatprep.subr.mxu1 %v252_v11 }
  0x2e   :  { %143 = vmatprep.subr.mxu0 %v70_v33  ;;  %303 = vmatpush1.msra.mxu1 %v251_v12 }
  0x2f   :  { %144 = vmatpush1.msra.mxu0 %v69_v34  ;;  %304 = vmatprep.subr.mxu1 %v250_v13 }
  0x30   :  { %305 = vmatpush1.msra.mxu1 %v249_v14 }
  0x31   :  { %306 = vmatprep.subr.mxu1 %v248_v15 }
  0x32   :  { %307 = vmatpush1.msra.mxu1 %v247_v16 }
  0x33   :  { %308 = vmatprep.subr.mxu1 %v246_v17 }
  0x34   :  { %309 = vmatpush1.msra.mxu1 %v245_v18 }
  0x35   :  { %310 = vmatprep.subr.mxu1 %v244_v19 }
  0x36   :  { %311 = vmatpush1.msra.mxu1 %v243_v20 }
  0x37   :  { %312 = vmatprep.subr.mxu1 %v242_v21 }
  0x38   :  { %313 = vmatpush1.msra.mxu1 %v241_v22 }
  0x39   :  { %314 = vmatprep.subr.mxu1 %v240_v23 }
  0x3a   :  { %315 = vmatpush1.msra.mxu1 %v239_v31 }
  0x82   :  { %v65_v37 = vpop.permute.xlu0 %64 }
  0x83   :  { %v68_v38 = vsel %vm67_vm1, %v56_v36, %v65_v37 }
  0x84   :  { %178 = vmatmul.mubr.f32.vlgmr.msra.gmra.mxu0 %v68_v38 }
  0x86   :  { %v203_v26 = vpop.permute.xlu0 %202 }
  0x8d   :  { %v235_v36 = vpop.permute.xlu0 %234 }
 0x144   :  { %v179_v44 = vpop.f32.mrf.mxu0 }
 0x145   :  { %v180_v45 = vadd.f32 %v179_v44, %v106_v43 }
 0x146   :  { %v181_v49 = vpop.f32.mrf.mxu0 }
 0x147   :  { %v425_v46 = vmul.f32 -1.442695, %v180_v45  ;;  %v594_v50 = vadd.f32 %v181_v49, %v110_v48 }
 0x149   :  { %443 = vpow2.f32 %v425_v46  ;;  %v426_v24 = vmul.f32 -1.442695, %v594_v50  ;;  %v281_v46 = vrot.slane %v431_v39, %v109_v47 }
 0x14a   :  { %445 = vtanh.f32 %v594_v50 }
 0x156   :  { %v444_v51 = vpop.eup %443 }
 0x157   :  { %v190_v52 = vadd.f32 1.0, %v444_v51  ;;  %v446_v54 = vpop.eup %445 }
 0x159   :  { %447 = vrcp.f32 %v190_v52 }
 0x15a   :  { %449 = vpow2.f32 %v426_v24 }
 0x166   :  { %v601_v55 = vpop.eup %447 }
 0x167   :  { %v206_v56 = vmul.f32 %v601_v55, %v446_v54  ;;  %v450_v25 = vpop.eup %449  ;;  %v205_v28 = vmul.f32 %v601_v55, %v203_v26 }
 0x168   :  { %v191_v27 = vadd.f32 1.0, %v450_v25 }
 0x169   :  { %208 = vrot.lane.b32.xlu1 %v206_v56, %s515_s14 }
 0x16a   :  { %451 = vrcp.f32 %v191_v27 }
 0x177   :  { %v452_v32 = vpop.eup %451 }
 0x1db   :  { %v209_v29 = vpop.permute.xlu1 %208 }
 0x1dc   :  { %v211_v30 = vadd.f32 %v209_v29, %v205_v28 }
 0x1de   :  { %453 = vtanh.f32 %v211_v30 }
 0x1eb   :  { %v454_v33 = vpop.eup %453 }
 0x1ec   :  { %v213_v34 = vmul.f32 %v454_v33, %v452_v32 }
 0x1ee   :  { %215 = vrot.lane.b32.xlu1 %v213_v34, %s515_s14 }
 0x1f2   :  { %373 = vrot.lane.b32.xlu1 %v434_v35, %s515_s14 }
 0x260   :  { %v216_v37 = vpop.permute.xlu1 %215 }
 0x261   :  { %219 = vst.msk [vmem:[%s651_s7] sm:$0x1] %vm218_vm2, %v216_v37  ;;  %v237_v38 = vsel %vm67_vm1, %v216_v37, %v235_v36 }
 0x262   :  { %349 = vmatmul.mubr.f32.vlgmr.msra.gmra.mxu1 %v237_v38 }
 0x264   :  { %v374_v56 = vpop.permute.xlu1 %373 }
 0x322   :  { %v350_v43 = vpop.f32.mrf.mxu1 }
 0x323   :  { %v351_v44 = vadd.f32 %v350_v43, %v277_v42 }
 0x324   :  { %v352_v48 = vpop.f32.mrf.mxu1 }
 0x325   :  { %v432_v45 = vmul.f32 -1.442695, %v351_v44  ;;  %v353_v49 = vadd.f32 %v352_v48, %v281_v46 }
 0x327   :  { %455 = vpow2.f32 %v432_v45  ;;  %v433_v41 = vmul.f32 -1.442695, %v353_v49 }
 0x328   :  { %457 = vtanh.f32 %v353_v49 }
 0x334   :  { %v456_v50 = vpop.eup %455 }
 0x335   :  { %v361_v51 = vadd.f32 1.0, %v456_v50  ;;  %v458_v52 = vpop.eup %457 }
 0x337   :  { %459 = vrcp.f32 %v361_v51 }
 0x338   :  { %461 = vpow2.f32 %v433_v41 }
 0x344   :  { %v460_v53 = vpop.eup %459 }
 0x345   :  { %v377_v54 = vmul.f32 %v460_v53, %v458_v52  ;;  %v462_v55 = vpop.eup %461  ;;  %v376_v40 = vmul.f32 %v460_v53, %v374_v56 }
 0x346   :  { %v362_v57 = vadd.f32 1.0, %v462_v55 }
 0x347   :  { %379 = vrot.lane.b32.xlu0 %v377_v54, %s515_s14 }
 0x348   :  { %463 = vrcp.f32 %v362_v57 }
 0x34b   :  { %221 = vrot.lane.b32.xlu0 %v211_v30, %s515_s14 }
 0x355   :  { %v464_v60 = vpop.eup %463 }
 0x3b9   :  { %v380_v47 = vpop.permute.xlu0 %379 }
 0x3ba   :  { %v382_v58 = vadd.f32 %v380_v47, %v376_v40 }
 0x3bc   :  { %465 = vtanh.f32 %v382_v58 }
 0x3bd   :  { %v222_v59 = vpop.permute.xlu0 %221 }
 0x3be   :  { %224 = vst.msk [vmem:[%s652_s8] sm:$0x1] %vm218_vm2, %v222_v59 }
 0x3c9   :  { %v466_v61 = vpop.eup %465 }
 0x3ca   :  { %v384_v62 = vmul.f32 %v466_v61, %v464_v60 }
 0x3cc   :  { %386 = vrot.lane.b32.xlu1 %v384_v62, %s515_s14 }
 0x3d0   :  { %392 = vrot.lane.b32.xlu1 %v382_v58, %s515_s14 }
 0x43e   :  { %v387_v63 = vpop.permute.xlu1 %386 }
 0x43f   :  { %435 = vst.msk [vmem:[%s651_s7 + $0x1] sm:$0x1] %vm218_vm2, %v387_v63  ;;  %397 = vst.msk [vmem:[#allocation7] sm:$0x1] %vm218_vm2, %v387_v63 }
 0x440   :  { %498 = shalt.err (!%p495_p10)
}
 0x441   :  { %407 = dma.vmem_to_hbm [thread:$0]  %s405_s9, 16, %s650_s6, [#allocation6]  }
 0x442   :  { %v393_v0 = vpop.permute.xlu1 %392 }
 0x443   :  { %436 = vst.msk [vmem:[%s652_s8 + $0x1] sm:$0x1] %vm218_vm2, %v393_v0 }
 0x444   :  { %509 = dma.done.wait [#allocation6], 16  }
 0x445   :  { %510 = vsyncadd [#allocation6], 4294967280 }
 0x446   :  { %419 = vsyncpa [#allocation5], 1 }
 0x447   :  { %420 = vsyncpa [#allocation6], 1 }

</bundles_post_ra>
